<compile_context>
chip_gen: v5e
topology: v5e:2x2
jax: 0.10.0
libtpu: 0.0.40
codegen_flags: <defaults>
</compile_context>

<pallas_src>
import math

import jax
import jax.numpy as jnp
from jax import lax
from jax.experimental import pallas as pl
from jax.experimental.pallas import tpu as pltpu


# ---------------------------------------------------------------------------
# Helpers
# ---------------------------------------------------------------------------
def _round_up(x, m):
    return (x + m - 1) // m * m


def _choose_tile(dim, target, align):
    """Tile size: a multiple of `align`, capped at `target` (target % align == 0)."""
    return min(_round_up(dim, align), target)


_VMEM_LIMIT_CACHE = None


def _vmem_limit():
    """Generation-aware scoped-VMEM request:
    ~80 MiB on 128-MiB chips (v5e/v6e), ~40 MiB on 64-MiB chips (v7x)."""
    global _VMEM_LIMIT_CACHE
    if _VMEM_LIMIT_CACHE is None:
        cap = 64 * 1024 * 1024
        try:
            cap = int(getattr(pltpu.get_tpu_info(), "vmem_capacity_bytes", cap))
        except Exception:
            pass
        _VMEM_LIMIT_CACHE = int(min(cap * 5 // 8, 96 * 1024 * 1024))
    return _VMEM_LIMIT_CACHE


# ---------------------------------------------------------------------------
# Kernel 1: dense layer  y = x @ W_t + b  (W_t pre-transposed once)
# ---------------------------------------------------------------------------
def _linear_kernel(x_ref, w_ref, b_ref, o_ref):
    acc = jnp.dot(x_ref[...], w_ref[...], preferred_element_type=jnp.float32)
    o_ref[...] = (acc + b_ref[...].astype(jnp.float32)).astype(o_ref.dtype)


def linear(x2d, w_t, b_row, *, tm_target=512, tn_target=512):
    """x2d: (N, d_in), w_t: (d_in, d_out), b_row: (1, d_out) -> (N, d_out)."""
    N, d_in = x2d.shape
    d_out = w_t.shape[1]
    vmem = _vmem_limit()

    tm = _choose_tile(N, tm_target, 16)          # 16: bf16-friendly sublane tile
    mn = pl.cdiv(N, tm)
    n_pad = mn * tm
    xp = x2d if n_pad == N else jnp.pad(x2d, ((0, n_pad - N), (0, 0)))

    w_bytes = d_in * d_out * w_t.dtype.itemsize
    if w_bytes <= min(16 * 1024 * 1024, vmem // 4):
        # Weight-resident path: W's block index is constant across the grid, so
        # it is DMA'd from HBM exactly once and stays in VMEM.
        out = pl.pallas_call(
            _linear_kernel,
            out_shape=jax.ShapeDtypeStruct((n_pad, d_out), x2d.dtype),
            grid=(mn,),
            in_specs=[
                pl.BlockSpec((tm, d_in), lambda i: (i, 0)),
                pl.BlockSpec((d_in, d_out), lambda i: (0, 0)),
                pl.BlockSpec((1, d_out), lambda i: (0, 0)),
            ],
            out_specs=pl.BlockSpec((tm, d_out), lambda i: (i, 0)),
            compiler_params=pltpu.CompilerParams(
                dimension_semantics=("parallel",),
                vmem_limit_bytes=vmem),
        )(xp, w_t, b_row)
    else:
        tn = _choose_tile(d_out, tn_target, 128)
        nn = pl.cdiv(d_out, tn)
        d_pad = nn * tn
        wp = w_t if d_pad == d_out else jnp.pad(w_t, ((0, 0), (0, d_pad - d_out)))
        bp = b_row if d_pad == d_out else jnp.pad(b_row, ((0, 0), (0, d_pad - d_out)))
        # TODO(synk): add a K (d_in) grid axis with a VMEM f32 accumulator for
        # very large d_in; un-tiled d_in is fine for typical transformer widths.
        out = pl.pallas_call(
            _linear_kernel,
            out_shape=jax.ShapeDtypeStruct((n_pad, d_pad), x2d.dtype),
            grid=(mn, nn),
            in_specs=[
                pl.BlockSpec((tm, d_in), lambda i, j: (i, 0)),
                pl.BlockSpec((d_in, tn), lambda i, j: (0, j)),
                pl.BlockSpec((1, tn), lambda i, j: (0, j)),
            ],
            out_specs=pl.BlockSpec((tm, tn), lambda i, j: (i, j)),
            compiler_params=pltpu.CompilerParams(
                dimension_semantics=("parallel", "parallel"),
                vmem_limit_bytes=vmem),
        )(xp, wp, bp)
        if d_pad != d_out:
            out = out[:, :d_out]
    return out if n_pad == N else out[:N]


# ---------------------------------------------------------------------------
# Kernel 2: flash-style multi-head attention (all heads per grid step).
# Layout: heads live in 128-aligned lane slots of width dk_slot; inputs may be
# the same fused QKV array selected via feature-block offsets.
# Grid: (B, q-tiles, kv-tiles); the kv axis is the online-softmax reduction.
# ---------------------------------------------------------------------------
def _make_attention_kernel(h, dk_slot, has_mask, needs_tail, sk_actual, tk):
    def kernel(*refs):
        if has_mask:
            q_ref, k_ref, v_ref, mask_ref, o_ref, m_sc, l_sc, acc_sc = refs
        else:
            q_ref, k_ref, v_ref, o_ref, m_sc, l_sc, acc_sc = refs
            mask_ref = None

        kb = pl.program_id(2)

        @pl.when(kb == 0)
        def _():
            m_sc[...] = jnp.full(m_sc.shape, -jnp.inf, dtype=jnp.float32)
            l_sc[...] = jnp.zeros(l_sc.shape, dtype=jnp.float32)
            acc_sc[...] = jnp.zeros(acc_sc.shape, dtype=jnp.float32)

        tq = q_ref.shape[1]

        # Additive score bias shared by every head (torch's mask.unsqueeze(1)):
        #   user mask == 0     -> -1e9 (finite; matches masked_fill semantics)
        #   padded key columns -> -inf (exactly zero softmax weight)
        bias = None
        if has_mask:
            bias = jnp.where(mask_ref[0] == 0, -1e9, 0.0)   # int8 compared directly
        if needs_tail:
            col = kb * tk + lax.broadcasted_iota(jnp.int32, (tq, tk), 1)
            in_range = col < sk_actual
            if bias is None:
                bias = jnp.where(in_range, 0.0, -jnp.inf)
            else:
                bias = jnp.where(in_range, bias, -jnp.inf)

        # Heads occupy 128-aligned lane slots -> all slices below are
        # lane-tile aligned (no masked vreg copies).
        for hh in range(h):
            lo = hh * dk_slot
            q_h = q_ref[0, :, lo:lo + dk_slot]              # (tq, dk_slot)
            k_h = k_ref[0, :, lo:lo + dk_slot]              # (tk, dk_slot)
            v_h = v_ref[0, :, lo:lo + dk_slot]              # (tk, dk_slot)

            # 1/sqrt(d_k) is folded into the Q projection weights.
            s = lax.dot_general(q_h, k_h, (((1,), (1,)), ((), ())),
                                preferred_element_type=jnp.float32)   # (tq, tk)
            if bias is not None:
                s = s + bias

            m_prev = m_sc[hh]
            m_new = jnp.maximum(m_prev, jnp.max(s, axis=-1, keepdims=True))
            alpha = jnp.exp(m_prev - m_new)
            p = jnp.exp(s - m_new)                                    # (tq, tk)
            l_sc[hh] = alpha * l_sc[hh] + jnp.sum(p, axis=-1, keepdims=True)
            pv = lax.dot_general(p.astype(v_h.dtype), v_h, (((1,), (0,)), ((), ())),
                                 preferred_element_type=jnp.float32)  # (tq, dk_slot)
            acc_sc[hh] = alpha * acc_sc[hh] + pv
            m_sc[hh] = m_new

        # TODO(synk): nn.Dropout(p=0.1) on the attention probabilities is
        # identity in eval mode; training-mode dropout is not implemented.

        @pl.when(kb == pl.num_programs(2) - 1)
        def _():
            for hh in range(h):
                lo = hh * dk_slot
                inv = 1.0 / l_sc[hh]          # exact reciprocal, epilogue-only
                o_ref[0, :, lo:lo + dk_slot] = (acc_sc[hh] * inv).astype(o_ref.dtype)

    return kernel


def _pad_rows(x, new_len):
    cur = x.shape[1]
    if new_len == cur:
        return x
    return jnp.pad(x, ((0, 0), (0, new_len - cur), (0, 0)))


def flash_attention(q, k, v, mask_i8, *, h, dk_slot,
                    q_fblock=0, k_fblock=0, v_fblock=0,
                    tq_target=256, tk_target=512):
    """q/k/v: (B, S, >= (fblock+1)*h*dk_slot); they may all be the SAME fused
    QKV array (selected via the *_fblock feature-block offsets).
    mask_i8: (B, Sq, Sk) int8 (1 = keep) or None.  Returns (B, Sq, h*dk_slot)."""
    HQ = h * dk_slot
    B, Sq, _ = q.shape
    Sk = k.shape[1]

    tq = _choose_tile(Sq, tq_target, 16)
    tk = _choose_tile(Sk, tk_target, 128)
    qn = pl.cdiv(Sq, tq)
    kn = pl.cdiv(Sk, tk)
    sq_pad = qn * tq
    sk_pad = kn * tk

    # Pad the sequence axis so every accessed block is fully in bounds.
    if q is k and k is v:
        q = k = v = _pad_rows(q, max(sq_pad, sk_pad))
    else:
        q = _pad_rows(q, sq_pad)
        if k is v:
            k = v = _pad_rows(k, sk_pad)
        else:
            k = _pad_rows(k, sk_pad)
            v = _pad_rows(v, sk_pad)

    has_mask = mask_i8 is not None
    needs_tail = sk_pad != Sk
    if has_mask and (mask_i8.shape[1] != sq_pad or mask_i8.shape[2] != sk_pad):
        mask_i8 = jnp.pad(mask_i8, ((0, 0),
                                    (0, sq_pad - mask_i8.shape[1]),
                                    (0, sk_pad - mask_i8.shape[2])))

    kernel = _make_attention_kernel(h, dk_slot, has_mask, needs_tail, Sk, tk)

    in_specs = [
        pl.BlockSpec((1, tq, HQ), lambda b, qi, ki: (b, qi, q_fblock)),
        pl.BlockSpec((1, tk, HQ), lambda b, qi, ki: (b, ki, k_fblock)),
        pl.BlockSpec((1, tk, HQ), lambda b, qi, ki: (b, ki, v_fblock)),
    ]
    args = [q, k, v]
    if has_mask:
        in_specs.append(pl.BlockSpec((1, tq, tk), lambda b, qi, ki: (b, qi, ki)))
        args.append(mask_i8)

    out = pl.pallas_call(
        kernel,
        out_shape=jax.ShapeDtypeStruct((B, sq_pad, HQ), q.dtype),
        grid=(B, qn, kn),
        in_specs=in_specs,
        out_specs=pl.BlockSpec((1, tq, HQ), lambda b, qi, ki: (b, qi, 0)),
        scratch_shapes=[
            pltpu.VMEM((h, tq, 1), jnp.float32),        # running max per head
            pltpu.VMEM((h, tq, 1), jnp.float32),        # running sum per head
            pltpu.VMEM((h, tq, dk_slot), jnp.float32),  # output accumulator per head
        ],
        compiler_params=pltpu.CompilerParams(
            # Leading B axis is "parallel" -> shards across the 2 TCs on v7x.
            dimension_semantics=("parallel", "parallel", "arbitrary"),
            vmem_limit_bytes=_vmem_limit()),
    )(*args)
    return out if sq_pad == Sq else out[:, :Sq, :]


# ---------------------------------------------------------------------------
# Parameter initialization / one-time preparation
# ---------------------------------------------------------------------------
def init_mha_params(key, d_model):
    """4 x nn.Linear(d_model, d_model), torch layout: (W: (out, in), b: (out,))."""
    params = []
    bound = 1.0 / math.sqrt(d_model)
    for _ in range(4):
        kw, kb, key = jax.random.split(key, 3)
        W = jax.random.uniform(kw, (d_model, d_model), jnp.float32, -bound, bound)
        b = jax.random.uniform(kb, (d_model,), jnp.float32, -bound, bound)
        params.append((W, b))
    return params


def prepare_mha_params(params, h, dtype=jnp.bfloat16):
    """One-time weight prep: transpose to x@W layout, fold 1/sqrt(d_k) into the
    Q projection, pad each head to a 128-lane slot, fuse Wq|Wk|Wv into one
    matrix, cast weights to `dtype` (biases stay f32)."""
    (Wq, bq), (Wk, bk), (Wv, bv), (Wo, bo) = params
    d_model = Wq.shape[0]
    assert d_model % h == 0
    d_k = d_model // h
    dk_slot = _round_up(d_k, 128)
    HQ = h * dk_slot
    scale = 1.0 / math.sqrt(d_k)

    def pad_in_proj(W, b, s):
        Wt = (W * s).T.reshape(d_model, h, d_k)
        Wt = jnp.zeros((d_model, h, dk_slot), Wt.dtype).at[:, :, :d_k].set(Wt)
        br = jnp.zeros((h, dk_slot), b.dtype).at[:, :d_k].set((b * s).reshape(h, d_k))
        return Wt.reshape(d_model, HQ), br.reshape(1, HQ)

    Wq_t, bq_r = pad_in_proj(Wq, bq, scale)     # 1/sqrt(d_k) folded here
    Wk_t, bk_r = pad_in_proj(Wk, bk, 1.0)
    Wv_t, bv_r = pad_in_proj(Wv, bv, 1.0)

    Wo_t = Wo.T.reshape(h, d_k, d_model)
    Wo_t = jnp.zeros((h, dk_slot, d_model), Wo_t.dtype).at[:, :d_k, :].set(Wo_t)
    Wo_t = Wo_t.reshape(HQ, d_model)

    return dict(
        h=h, d_k=d_k, dk_slot=dk_slot, d_model=d_model, dtype=dtype,
        Wqkv_t=jnp.concatenate([Wq_t, Wk_t, Wv_t], axis=1).astype(dtype),
        bqkv=jnp.concatenate([bq_r, bk_r, bv_r], axis=1).astype(jnp.float32),
        Wo_t=Wo_t.astype(dtype),
        bo=bo.reshape(1, d_model).astype(jnp.float32),
    )


# ---------------------------------------------------------------------------
# Full MultiHeadedAttention forward pass (eval mode)
# ---------------------------------------------------------------------------
def multi_headed_attention(prepared, query, key, value, mask=None):
    h = prepared["h"]
    dk_slot = prepared["dk_slot"]
    d_model = prepared["d_model"]
    dt = prepared["dtype"]
    HQ = h * dk_slot

    B, Sq, _ = query.shape
    Sk = key.shape[1]
    Wqkv_t, bqkv = prepared["Wqkv_t"], prepared["bqkv"]

    if query is key and key is value:
        # Self-attention: one fused QKV projection (activation read once), and
        # the fused array feeds attention directly via feature-block offsets.
        x = query.astype(dt).reshape(B * Sq, d_model)
        qkv = linear(x, Wqkv_t, bqkv).reshape(B, Sq, 3 * HQ)
        q = k = v = qkv
        fb = (0, 1, 2)
    else:
        q = linear(query.astype(dt).reshape(B * Sq, d_model),
                   Wqkv_t[:, :HQ], bqkv[:, :HQ]).reshape(B, Sq, HQ)
        if key is value:
            kv = linear(key.astype(dt).reshape(B * Sk, d_model),
                        Wqkv_t[:, HQ:], bqkv[:, HQ:]).reshape(B, Sk, 2 * HQ)
            k = v = kv
            fb = (0, 0, 1)
        else:
            k = linear(key.astype(dt).reshape(B * Sk, d_model),
                       Wqkv_t[:, HQ:2 * HQ], bqkv[:, HQ:2 * HQ]).reshape(B, Sk, HQ)
            v = linear(value.astype(dt).reshape(B * Sk, d_model),
                       Wqkv_t[:, 2 * HQ:], bqkv[:, 2 * HQ:]).reshape(B, Sk, HQ)
            fb = (0, 0, 0)

    if mask is None:
        mask_i8 = None                          # no mask array built / DMA'd
    else:
        # torch: mask.unsqueeze(1) broadcasts over heads; one int8 mask tile is
        # shared by all heads inside the kernel (1 byte/element HBM traffic).
        mask_i8 = (jnp.broadcast_to(mask, (B, Sq, Sk)) != 0).astype(jnp.int8)

    ctx = flash_attention(q, k, v, mask_i8, h=h, dk_slot=dk_slot,
                          q_fblock=fb[0], k_fblock=fb[1], v_fblock=fb[2])

    out = linear(ctx.reshape(B * Sq, HQ), prepared["Wo_t"], prepared["bo"])
    return out.reshape(B, Sq, d_model)


# ---------------------------------------------------------------------------
# Pure-JAX reference (mirrors the PyTorch code) for correctness checks.
# ---------------------------------------------------------------------------
def mha_reference(params, h, query, key, value, mask=None):
    B, Sq, d_model = query.shape
    Sk = key.shape[1]
    d_k = d_model // h
    (Wq, bq), (Wk, bk), (Wv, bv), (Wo, bo) = params

    def proj(x, W, b, S):
        y = x @ W.T + b
        return y.reshape(B, S, h, d_k).transpose(0, 2, 1, 3)

    q = proj(query, Wq, bq, Sq)
    k = proj(key, Wk, bk, Sk)
    v = proj(value, Wv, bv, Sk)
    scores = jnp.einsum("bhqd,bhkd->bhqk", q, k) / math.sqrt(d_k)
    if mask is not None:
        m = jnp.broadcast_to(mask.astype(jnp.float32)[:, None], scores.shape)
        scores = jnp.where(m == 0, -1e9, scores)
    p = jax.nn.softmax(scores, axis=-1)
    x = jnp.einsum("bhqk,bhkd->bhqd", p, v)
    x = x.transpose(0, 2, 1, 3).reshape(B, Sq, d_model)
    return x @ Wo.T + bo


if __name__ == "__main__":
    # Small, module-consistent shapes: batch=2, seq=8, d_model=32, heads=4.
    B, S, d_model, h = 2, 8, 32, 4

    root = jax.random.PRNGKey(0)
    kp, kx, kq, kk, kv = jax.random.split(root, 5)

    params = init_mha_params(kp, d_model)

    x = jax.random.normal(kx, (B, S, d_model), jnp.float32)
    # Causal mask (B, S, S): 1 = keep, 0 = mask out.
    mask = jnp.broadcast_to(jnp.tril(jnp.ones((S, S), jnp.float32)), (B, S, S))

    # 1) float32 path, fused self-attention with a causal mask (tight check).
    prep_f32 = prepare_mha_params(params, h, dtype=jnp.float32)
    out = jax.block_until_ready(multi_headed_attention(prep_f32, x, x, x, mask=mask))
    ref = mha_reference(params, h, x, x, x, mask=mask)
    assert out.shape == (B, S, d_model)
    assert jnp.allclose(out, ref, atol=2e-3, rtol=2e-3), float(jnp.abs(out - ref).max())

    # 2) bf16 path (default), fused self-attention with mask (loose check).
    prep_bf16 = prepare_mha_params(params, h)
    out_bf = jax.block_until_ready(
        multi_headed_attention(prep_bf16, x, x, x, mask=mask)).astype(jnp.float32)
    assert jnp.allclose(out_bf, ref, atol=6e-2, rtol=6e-2), \
        float(jnp.abs(out_bf - ref).max())

    # 3) bf16 path, distinct q/k/v projections and no mask
    #    (exercises the non-fused projections and the mask-free kernel).
    query = jax.random.normal(kq, (B, S, d_model), jnp.float32)
    key_ = jax.random.normal(kk, (B, S, d_model), jnp.float32)
    value = jax.random.normal(kv, (B, S, d_model), jnp.float32)
    out_x = jax.block_until_ready(
        multi_headed_attention(prep_bf16, query, key_, value, mask=None)
    ).astype(jnp.float32)
    ref_x = mha_reference(params, h, query, key_, value, mask=None)
    assert jnp.allclose(out_x, ref_x, atol=6e-2, rtol=6e-2), \
        float(jnp.abs(out_x - ref_x).max())

    print("KERNEL_OK")
</pallas_src>

<mosaic_0001>
module attributes {stable_mosaic.version = 11 : i64} {
  func.func @_linear_kernel(%arg0: i32, %arg1: memref<16x32xf32, #tpu.memory_space<vmem>>, %arg2: memref<32x1536xf32, #tpu.memory_space<vmem>>, %arg3: memref<1x1536xf32, #tpu.memory_space<vmem>>, %arg4: memref<16x1536xf32, #tpu.memory_space<vmem>>) attributes {dimension_semantics = [#tpu.dimension_semantics<parallel>], iteration_bounds = array<i64: 1>, scalar_prefetch = 0 : i64, scratch_operands = 0 : i64, tpu.core_type = #tpu.core_type<tc>, window_params = [{transform_indices = @transform_0, window_bounds = array<i64: 16, 32>}, {pipeline_mode = #tpu.pipeline_mode<synchronous>, transform_indices = @transform_1, window_bounds = array<i64: 32, 1536>}, {pipeline_mode = #tpu.pipeline_mode<synchronous>, transform_indices = @transform_2, window_bounds = array<i64: 1, 1536>}, {transform_indices = @transform_3, window_bounds = array<i64: 16, 1536>}]} {
    %c0 = arith.constant 0 : index
    %c0_0 = arith.constant 0 : index
    %0 = vector.load %arg1[%c0, %c0_0] : memref<16x32xf32, #tpu.memory_space<vmem>>, vector<16x32xf32>
    %c0_1 = arith.constant 0 : index
    %c0_2 = arith.constant 0 : index
    %1 = vector.load %arg2[%c0_1, %c0_2] : memref<32x1536xf32, #tpu.memory_space<vmem>>, vector<32x1536xf32>
    %cst = arith.constant dense<0.000000e+00> : vector<16x1536xf32>
    %2 = tpu.matmul %0, %1, %cst {dimension_numbers = #tpu.dot_dimension_numbers<[1], [0], [0], [1], [0, 0, 1, 1], [], []>} : vector<16x32xf32>, vector<32x1536xf32>, vector<16x1536xf32> -> vector<16x1536xf32>
    %c0_3 = arith.constant 0 : index
    %c0_4 = arith.constant 0 : index
    %3 = vector.load %arg3[%c0_3, %c0_4] : memref<1x1536xf32, #tpu.memory_space<vmem>>, vector<1x1536xf32>
    %4 = vector.broadcast %3 : vector<1x1536xf32> to vector<16x1536xf32>
    %5 = arith.addf %2, %4 : vector<16x1536xf32>
    %c0_5 = arith.constant 0 : index
    %c0_6 = arith.constant 0 : index
    %6 = vector.load %arg4[%c0_5, %c0_6] : memref<16x1536xf32, #tpu.memory_space<vmem>>, vector<16x1536xf32>
    tpu.vector_store %arg4[%c0_5, %c0_6], %5 {strides = array<i32>} : memref<16x1536xf32, #tpu.memory_space<vmem>>, vector<16x1536xf32>,
    return
  }
  func.func @transform_0(%arg0: i32) -> (i32, i32) {
    %c0_i32 = arith.constant 0 : i32
    %c0_i32_0 = arith.constant 0 : i32
    return %arg0, %c0_i32 : i32, i32
  }
  func.func @transform_1(%arg0: i32) -> (i32, i32) {
    %c0_i32 = arith.constant 0 : i32
    %c0_i32_0 = arith.constant 0 : i32
    %c0_i32_1 = arith.constant 0 : i32
    return %c0_i32, %c0_i32_0 : i32, i32
  }
  func.func @transform_2(%arg0: i32) -> (i32, i32) {
    %c0_i32 = arith.constant 0 : i32
    %c0_i32_0 = arith.constant 0 : i32
    %c0_i32_1 = arith.constant 0 : i32
    return %c0_i32, %c0_i32_0 : i32, i32
  }
  func.func @transform_3(%arg0: i32) -> (i32, i32) {
    %c0_i32 = arith.constant 0 : i32
    %c0_i32_0 = arith.constant 0 : i32
    return %arg0, %c0_i32 : i32, i32
  }
}

</mosaic_0001>

<bundles_post_ra>
// kernel: tpu_custom_call.1
= control target key start
LH: loop header
LB: loop body
LE: loop exit
PB: predicated region body
PF: predicated region fallthrough
CT: control target
= control target key end

     0   :  { %8 = vsyncpa [#allocation3], 0  ;;  %s697_s0 = inlined_call_operand.hbm [shape: f32[16,32], index: 0, kind: input, shape index: {}]   ;;  %s698_s1 = inlined_call_operand.hbm [shape: f32[32,1536], index: 1, kind: input, shape index: {}]   ;;  %s699_s2 = inlined_call_operand.hbm [shape: f32[1,1536], index: 2, kind: input, shape index: {}]   ;;  %s700_s3 = inlined_call_operand.hbm [shape: f32[16,1536], index: 3, kind: output, shape index: {}]  }
   0x1   :  { %9 = vsyncpa [#allocation6], 0  ;;  %s28_s14 = sshll.u32 %s698_s1, 4  ;;  %s29_s14 = int_to_ptr.hbm [resolvable:$true] %s28_s14 }
   0x2   :  { %10 = vsyncpa [#allocation4], 0  ;;  %s599_s15 = smov [#allocation5]   ;;  %s15_s19 = sshll.u32 %s697_s0, 4  ;;  %s16_s19 = int_to_ptr.hbm [resolvable:$true] %s15_s19 }
   0x3   :  { %s30_s16 = sshll.u32 %s599_s15, 4  ;;  %s600_s20 = smov 1536   ;;  %s31_s16 = int_to_ptr.vmem [resolvable:$true] %s30_s16 }
   0x4   :  { %s601_s21 = smov 96   ;;  %s602_s22 = smov [#allocation2]  }
   0x5   :  { %36 = dma.hbm_to_vmem [thread:$0]  %s29_s14, 6144, %s31_s16, [#allocation6], %s600_s20, %s600_s20, %s601_s21  }
   0x6   :  { %s17_s23 = sshll.u32 %s602_s22, 4  ;;  %s603_s1 = smov 128   ;;  %s18_s23 = int_to_ptr.vmem [resolvable:$true] %s17_s23 }
   0x7   :  { %s604_s24 = smov 8   ;;  %s42_s27 = sshll.u32 %s699_s2, 4  ;;  %s43_s27 = int_to_ptr.hbm [resolvable:$true] %s42_s27 }
   0x8   :  { %23 = dma.hbm_to_vmem [thread:$0]  %s16_s19, 256, %s18_s23, [#allocation3], %s603_s1, %s603_s1, %s604_s24  }
   0x9   :  { %s605_s28 = smov [#allocation7]  }
   0xa   :  { %s44_s0 = sshll.u32 %s605_s28, 4  ;;  %s45_s0 = int_to_ptr.vmem [resolvable:$true] %s44_s0 }
   0xb   :  { %47 = dma.hbm_to_vmem [thread:$0]  %s43_s27, 192, %s45_s0, [#allocation6]  }
   0xc   :  { %593 = dma.done.wait [#allocation3], 256  }
   0xd   :  { %594 = vsyncadd [#allocation3], 4294967040 }
   0xe   :  { %595 = dma.done.wait [#allocation6], 6336  }
   0xf   :  { %596 = vsyncadd [#allocation6], 4294960960  ;;  %v100_v0 = vld [vmem:[#allocation5 + $0x130] sm:$0xff]  ;;  %v101_v1 = vld [vmem:[#allocation5 + $0x138] sm:$0xff]  ;;  %vm138_vm0 = vcmask 261120   ;;  %s606_s2 = smov [#allocation8]  }
  0x10   :  { %v88_v2 = vld [vmem:[#allocation5 + $0xd0] sm:$0xff]  ;;  %203 = vmatpush.msra.mxu2 %v100_v0  ;;  %226 = vmatpush.msra.mxu3 %v101_v1  ;;  %v89_v3 = vld [vmem:[#allocation5 + $0xd8] sm:$0xff]  ;;  %v98_v6 = vld [vmem:[#allocation5 + $0x120] sm:$0xff]  ;;  %s449_s29 = sshll.u32 %s606_s2, 4  ;;  %s451_s5 = sshll.u32 %s700_s3, 4  ;;  %s450_s29 = int_to_ptr.vmem [resolvable:$true] %s449_s29  ;;  %s452_s5 = int_to_ptr.hbm [resolvable:$true] %s451_s5 }
  0x11   :  { %v76_v4 = vld [vmem:[#allocation5 + $0x70] sm:$0xff]  ;;  %v77_v5 = vld [vmem:[#allocation5 + $0x78] sm:$0xff]  ;;  %v99_v7 = vld [vmem:[#allocation5 + $0x128] sm:$0xff]  ;;  %157 = vmatpush.msra.mxu0 %v98_v6 }
  0x12   :  { %204 = vmatpush.msra.mxu2 %v88_v2  ;;  %227 = vmatpush.msra.mxu3 %v89_v3  ;;  %v64_v8 = vld [vmem:[#allocation5 + $0x10] sm:$0xff]  ;;  %v65_v9 = vld [vmem:[#allocation5 + $0x18] sm:$0xff]  ;;  %v86_v10 = vld [vmem:[#allocation5 + $0xc0] sm:$0xff] }
  0x13   :  { %180 = vmatpush.msra.mxu1 %v99_v7  ;;  %v87_v11 = vld [vmem:[#allocation5 + $0xc8] sm:$0xff]  ;;  %v639_v12 = vld [vmem:[#allocation2] sm:$0xff]  ;;  %v105_v14 = vld [vmem:[#allocation5 + $0x158] sm:$0xff]  ;;  %158 = vmatpush.msra.mxu0 %v86_v10 }
  0x14   :  { %205 = vmatpush.msra.mxu2 %v76_v4  ;;  %228 = vmatpush.msra.mxu3 %v77_v5  ;;  %v104_v13 = vld [vmem:[#allocation5 + $0x150] sm:$0xff]  ;;  %v74_v15 = vld [vmem:[#allocation5 + $0x60] sm:$0xff]  ;;  %v75_v16 = vld [vmem:[#allocation5 + $0x68] sm:$0xff] }
  0x15   :  { %181 = vmatpush.msra.mxu1 %v87_v11  ;;  %v92_v17 = vld [vmem:[#allocation5 + $0xf0] sm:$0xff]  ;;  %v93_v18 = vld [vmem:[#allocation5 + $0xf8] sm:$0xff]  ;;  %v62_v19 = vld [vmem:[#allocation5] sm:$0xff]  ;;  %159 = vmatpush.msra.mxu0 %v74_v15 }
  0x16   :  { %206 = vmatpush.msra.mxu2 %v64_v8  ;;  %229 = vmatpush.msra.mxu3 %v65_v9  ;;  %v63_v20 = vld [vmem:[#allocation5 + $0x8] sm:$0xff]  ;;  %v102_v21 = vld [vmem:[#allocation5 + $0x140] sm:$0xff]  ;;  %v80_v23 = vld [vmem:[#allocation5 + $0x90] sm:$0xff] }
  0x17   :  { %469 = vmatmul.msk.f32.vlgmr.msra.gmra.mxu2 %vm138_vm0, %v639_v12  ;;  %471 = vmatmul.msk.f32.vlgmr.msra.gmra.mxu3 %vm138_vm0, %v639_v12  ;;  %v103_v22 = vld [vmem:[#allocation5 + $0x148] sm:$0xff]  ;;  %v81_v24 = vld [vmem:[#allocation5 + $0x98] sm:$0xff]  ;;  %v90_v26 = vld [vmem:[#allocation5 + $0xe0] sm:$0xff] }
  0x18   :  { %295 = vmatpush.msrb.mxu2 %v104_v13  ;;  %318 = vmatpush.msrb.mxu3 %v105_v14  ;;  %v649_v25 = vld [vmem:[#allocation2 + $0x8] sm:$0xff]  ;;  %v91_v27 = vld [vmem:[#allocation5 + $0xe8] sm:$0xff]  ;;  %v68_v28 = vld [vmem:[#allocation5 + $0x30] sm:$0xff] }
  0x19   :  { %182 = vmatpush.msra.mxu1 %v75_v16  ;;  %160 = vmatpush.msra.mxu0 %v62_v19  ;;  %v69_v29 = vld [vmem:[#allocation5 + $0x38] sm:$0xff]  ;;  %v78_v30 = vld [vmem:[#allocation5 + $0x80] sm:$0xff]  ;;  %v79_v31 = vld [vmem:[#allocation5 + $0x88] sm:$0xff] }
  0x1a   :  { %296 = vmatpush.msrb.mxu2 %v92_v17  ;;  %319 = vmatpush.msrb.mxu3 %v93_v18  ;;  %v108_v32 = vld [vmem:[#allocation5 + $0x170] sm:$0xff]  ;;  %v109_v33 = vld [vmem:[#allocation5 + $0x178] sm:$0xff]  ;;  %v66_v34 = vld [vmem:[#allocation5 + $0x20] sm:$0xff] }
  0x1b   :  { %183 = vmatpush.msra.mxu1 %v63_v20  ;;  %465 = vmatmul.msk.f32.vlgmr.msra.gmra.mxu0 %vm138_vm0, %v639_v12  ;;  %v67_v35 = vld [vmem:[#allocation5 + $0x28] sm:$0xff]  ;;  %v96_v36 = vld [vmem:[#allocation5 + $0x110] sm:$0xff]  ;;  %v97_v37 = vld [vmem:[#allocation5 + $0x118] sm:$0xff] }
  0x1c   :  { %467 = vmatmul.msk.f32.vlgmr.msra.gmra.mxu1 %vm138_vm0, %v639_v12  ;;  %249 = vmatpush.msrb.mxu0 %v102_v21  ;;  %v106_v38 = vld [vmem:[#allocation5 + $0x160] sm:$0xff]  ;;  %v107_v39 = vld [vmem:[#allocation5 + $0x168] sm:$0xff]  ;;  %v84_v40 = vld [vmem:[#allocation5 + $0xb0] sm:$0xff] }
  0x1d   :  { %272 = vmatpush.msrb.mxu1 %v103_v22  ;;  %297 = vmatpush.msrb.mxu2 %v80_v23  ;;  %v85_v41 = vld [vmem:[#allocation5 + $0xb8] sm:$0xff]  ;;  %v94_v42 = vld [vmem:[#allocation5 + $0x100] sm:$0xff]  ;;  %v95_v43 = vld [vmem:[#allocation5 + $0x108] sm:$0xff] }
  0x1e   :  { %320 = vmatpush.msrb.mxu3 %v81_v24  ;;  %250 = vmatpush.msrb.mxu0 %v90_v26  ;;  %v72_v44 = vld [vmem:[#allocation5 + $0x50] sm:$0xff]  ;;  %v73_v45 = vld [vmem:[#allocation5 + $0x58] sm:$0xff]  ;;  %v82_v46 = vld [vmem:[#allocation5 + $0xa0] sm:$0xff] }
  0x1f   :  { %470 = vmatmul.msk.f32.gmra.mxu2 %vm138_vm0, %v649_v25  ;;  %472 = vmatmul.msk.f32.gmra.mxu3 %vm138_vm0, %v649_v25  ;;  %v83_v47 = vld [vmem:[#allocation5 + $0xa8] sm:$0xff]  ;;  %v70_v48 = vld [vmem:[#allocation5 + $0x40] sm:$0xff] }
  0x20   :  { %273 = vmatpush.msrb.mxu1 %v91_v27  ;;  %298 = vmatpush.msrb.mxu2 %v68_v28  ;;  %v71_v49 = vld [vmem:[#allocation5 + $0x48] sm:$0xff]  ;;  %v110_v50 = vld [vmem:[#allocation7] sm:$0xff] }
  0x21   :  { %321 = vmatpush.msrb.mxu3 %v69_v29  ;;  %251 = vmatpush.msrb.mxu0 %v78_v30  ;;  %v114_v51 = vperm.slane %v110_v50, 0  ;;  %v115_v52 = vperm.slane %v110_v50, 1  ;;  %v116_v53 = vperm.slane %v110_v50, 2  ;;  %v117_v54 = vperm.slane %v110_v50, 3  ;;  %v111_v27 = vld [vmem:[#allocation7 + $0x8] sm:$0xf] }
  0x22   :  { %274 = vmatpush.msrb.mxu1 %v79_v31  ;;  %387 = vmatpush.msra.mxu2 %v108_v32  ;;  %v118_v7 = vperm.slane %v110_v50, 4  ;;  %v119_v8 = vperm.slane %v110_v50, 5  ;;  %v120_v9 = vperm.slane %v110_v50, 6  ;;  %v121_v10 = vperm.slane %v110_v50, 7 }
  0x23   :  { %410 = vmatpush.msra.mxu3 %v109_v33  ;;  %466 = vmatmul.msk.f32.gmra.mxu0 %vm138_vm0, %v649_v25  ;;  %v122_v28 = vperm.slane %v111_v27, 0  ;;  %v123_v29 = vperm.slane %v111_v27, 1  ;;  %v124_v30 = vperm.slane %v111_v27, 2  ;;  %v125_v31 = vperm.slane %v111_v27, 3 }
  0x24   :  { %468 = vmatmul.msk.f32.gmra.mxu1 %vm138_vm0, %v649_v25  ;;  %252 = vmatpush.msrb.mxu0 %v66_v34 }
  0x25   :  { %275 = vmatpush.msrb.mxu1 %v67_v35  ;;  %388 = vmatpush.msra.mxu2 %v96_v36 }
  0x26   :  { %411 = vmatpush.msra.mxu3 %v97_v37  ;;  %341 = vmatpush.msra.mxu0 %v106_v38 }
  0x27   :  { %477 = vmatmul.msk.f32.vlgmr.msrb.gmra.mxu2 %vm138_vm0, %v639_v12  ;;  %479 = vmatmul.msk.f32.vlgmr.msrb.gmra.mxu3 %vm138_vm0, %v639_v12 }
  0x28   :  { %364 = vmatpush.msra.mxu1 %v107_v39  ;;  %389 = vmatpush.msra.mxu2 %v84_v40 }
  0x29   :  { %412 = vmatpush.msra.mxu3 %v85_v41  ;;  %342 = vmatpush.msra.mxu0 %v94_v42 }
  0x2a   :  { %365 = vmatpush.msra.mxu1 %v95_v43  ;;  %390 = vmatpush.msra.mxu2 %v72_v44 }
  0x2b   :  { %413 = vmatpush.msra.mxu3 %v73_v45  ;;  %473 = vmatmul.msk.f32.vlgmr.msrb.gmra.mxu0 %vm138_vm0, %v639_v12 }
  0x2c   :  { %475 = vmatmul.msk.f32.vlgmr.msrb.gmra.mxu1 %vm138_vm0, %v639_v12  ;;  %343 = vmatpush.msra.mxu0 %v82_v46 }
  0x2d   :  { %366 = vmatpush.msra.mxu1 %v83_v47 }
  0x2e   :  { %344 = vmatpush.msra.mxu0 %v70_v48 }
  0x2f   :  { %478 = vmatmul.msk.f32.gmra.mxu2 %vm138_vm0, %v649_v25  ;;  %480 = vmatmul.msk.f32.gmra.mxu3 %vm138_vm0, %v649_v25 }
  0x30   :  { %367 = vmatpush.msra.mxu1 %v71_v49 }
  0x33   :  { %474 = vmatmul.msk.f32.gmra.mxu0 %vm138_vm0, %v649_v25 }
  0x34   :  { %476 = vmatmul.msk.f32.gmra.mxu1 %vm138_vm0, %v649_v25 }
  0x37   :  { %485 = vmatmul.msk.f32.vlgmr.msra.gmra.mxu2 %vm138_vm0, %v639_v12  ;;  %487 = vmatmul.msk.f32.vlgmr.msra.gmra.mxu3 %vm138_vm0, %v639_v12 }
  0x3b   :  { %481 = vmatmul.msk.f32.vlgmr.msra.gmra.mxu0 %vm138_vm0, %v639_v12 }
  0x3c   :  { %483 = vmatmul.msk.f32.vlgmr.msra.gmra.mxu1 %vm138_vm0, %v639_v12 }
  0x3f   :  { %486 = vmatmul.msk.f32.gmra.mxu2 %vm138_vm0, %v649_v25  ;;  %488 = vmatmul.msk.f32.gmra.mxu3 %vm138_vm0, %v649_v25 }
  0x43   :  { %482 = vmatmul.msk.f32.gmra.mxu0 %vm138_vm0, %v649_v25 }
  0x44   :  { %484 = vmatmul.msk.f32.gmra.mxu1 %vm138_vm0, %v649_v25 }
  0x98   :  { %v162_v55 = vpop.f32.mrf.mxu0 }
  0x99   :  { %v185_v56 = vpop.f32.mrf.mxu1  ;;  %v163_v57 = vadd.f32 %v162_v55, %v114_v51 }
  0x9a   :  { %v186_v58 = vadd.f32 %v185_v56, %v115_v52  ;;  %v208_v59 = vpop.f32.mrf.mxu2  ;;  %v231_v60 = vpop.f32.mrf.mxu3 }
  0x9b   :  { %v209_v61 = vadd.f32 %v208_v59, %v116_v53  ;;  %v232_v62 = vadd.f32 %v231_v60, %v117_v54  ;;  %421 = vst [vmem:[#allocation8] sm:$0xff] %v163_v57 }
  0x9c   :  { %422 = vst [vmem:[#allocation8 + $0x8] sm:$0xff] %v186_v58 }
  0x9d   :  { %423 = vst [vmem:[#allocation8 + $0x10] sm:$0xff] %v209_v61 }
  0x9e   :  { %424 = vst [vmem:[#allocation8 + $0x18] sm:$0xff] %v232_v62 }
  0xa0   :  { %v165_v63 = vpop.f32.mrf.mxu0 }
  0xa1   :  { %v188_v0 = vpop.f32.mrf.mxu1  ;;  %v166_v1 = vadd.f32 %v165_v63, %v114_v51 }
  0xa2   :  { %v189_v2 = vadd.f32 %v188_v0, %v115_v52  ;;  %v211_v3 = vpop.f32.mrf.mxu2  ;;  %v234_v4 = vpop.f32.mrf.mxu3 }
  0xa3   :  { %v212_v5 = vadd.f32 %v211_v3, %v116_v53  ;;  %v235_v6 = vadd.f32 %v234_v4, %v117_v54  ;;  %433 = vst [vmem:[#allocation8 + $0x60] sm:$0xff] %v166_v1 }
  0xa4   :  { %434 = vst [vmem:[#allocation8 + $0x68] sm:$0xff] %v189_v2 }
  0xa5   :  { %435 = vst [vmem:[#allocation8 + $0x70] sm:$0xff] %v212_v5 }
  0xa6   :  { %436 = vst [vmem:[#allocation8 + $0x78] sm:$0xff] %v235_v6 }
  0xa8   :  { %v254_v11 = vpop.f32.mrf.mxu0 }
  0xa9   :  { %v277_v12 = vpop.f32.mrf.mxu1  ;;  %v255_v13 = vadd.f32 %v254_v11, %v118_v7 }
  0xaa   :  { %v278_v14 = vadd.f32 %v277_v12, %v119_v8  ;;  %v300_v15 = vpop.f32.mrf.mxu2  ;;  %v323_v16 = vpop.f32.mrf.mxu3 }
  0xab   :  { %v301_v17 = vadd.f32 %v300_v15, %v120_v9  ;;  %v324_v18 = vadd.f32 %v323_v16, %v121_v10  ;;  %425 = vst [vmem:[#allocation8 + $0x20] sm:$0xff] %v255_v13 }
  0xac   :  { %426 = vst [vmem:[#allocation8 + $0x28] sm:$0xff] %v278_v14 }
  0xad   :  { %427 = vst [vmem:[#allocation8 + $0x30] sm:$0xff] %v301_v17 }
  0xae   :  { %428 = vst [vmem:[#allocation8 + $0x38] sm:$0xff] %v324_v18 }
  0xb0   :  { %v257_v19 = vpop.f32.mrf.mxu0 }
  0xb1   :  { %v280_v20 = vpop.f32.mrf.mxu1  ;;  %v258_v21 = vadd.f32 %v257_v19, %v118_v7 }
  0xb2   :  { %v281_v22 = vadd.f32 %v280_v20, %v119_v8  ;;  %v303_v23 = vpop.f32.mrf.mxu2  ;;  %v326_v24 = vpop.f32.mrf.mxu3 }
  0xb3   :  { %v304_v25 = vadd.f32 %v303_v23, %v120_v9  ;;  %v327_v26 = vadd.f32 %v326_v24, %v121_v10  ;;  %437 = vst [vmem:[#allocation8 + $0x80] sm:$0xff] %v258_v21 }
  0xb4   :  { %438 = vst [vmem:[#allocation8 + $0x88] sm:$0xff] %v281_v22 }
  0xb5   :  { %439 = vst [vmem:[#allocation8 + $0x90] sm:$0xff] %v304_v25 }
  0xb6   :  { %440 = vst [vmem:[#allocation8 + $0x98] sm:$0xff] %v327_v26 }
  0xb8   :  { %v346_v32 = vpop.f32.mrf.mxu0 }
  0xb9   :  { %v369_v33 = vpop.f32.mrf.mxu1  ;;  %v347_v34 = vadd.f32 %v346_v32, %v122_v28 }
  0xba   :  { %v370_v35 = vadd.f32 %v369_v33, %v123_v29  ;;  %v392_v36 = vpop.f32.mrf.mxu2  ;;  %v415_v37 = vpop.f32.mrf.mxu3 }
  0xbb   :  { %v393_v38 = vadd.f32 %v392_v36, %v124_v30  ;;  %v416_v39 = vadd.f32 %v415_v37, %v125_v31  ;;  %429 = vst [vmem:[#allocation8 + $0x40] sm:$0xff] %v347_v34 }
  0xbc   :  { %430 = vst [vmem:[#allocation8 + $0x48] sm:$0xff] %v370_v35 }
  0xbd   :  { %431 = vst [vmem:[#allocation8 + $0x50] sm:$0xff] %v393_v38 }
  0xbe   :  { %432 = vst [vmem:[#allocation8 + $0x58] sm:$0xff] %v416_v39 }
  0xc0   :  { %v349_v40 = vpop.f32.mrf.mxu0 }
  0xc1   :  { %v372_v41 = vpop.f32.mrf.mxu1  ;;  %v350_v42 = vadd.f32 %v349_v40, %v122_v28 }
  0xc2   :  { %v373_v43 = vadd.f32 %v372_v41, %v123_v29  ;;  %v395_v44 = vpop.f32.mrf.mxu2  ;;  %v418_v45 = vpop.f32.mrf.mxu3 }
  0xc3   :  { %v396_v46 = vadd.f32 %v395_v44, %v124_v30  ;;  %v419_v47 = vadd.f32 %v418_v45, %v125_v31  ;;  %441 = vst [vmem:[#allocation8 + $0xa0] sm:$0xff] %v350_v42 }
  0xc4   :  { %442 = vst [vmem:[#allocation8 + $0xa8] sm:$0xff] %v373_v43 }
  0xc5   :  { %443 = vst [vmem:[#allocation8 + $0xb0] sm:$0xff] %v396_v46 }
  0xc6   :  { %444 = vst [vmem:[#allocation8 + $0xb8] sm:$0xff] %v419_v47 }
  0xc7   :  { %457 = dma.vmem_to_hbm [thread:$0]  %s450_s29, 3072, %s452_s5, [#allocation4], %s600_s20, %s600_s20, %s601_s21  }
  0xc8   :  { %597 = dma.done.wait [#allocation4], 3072  }
  0xc9   :  { %598 = vsyncadd [#allocation4], 4294964224 }
  0xca   :  { %462 = vsyncpa [#allocation3], 1 }
  0xcb   :  { %463 = vsyncpa [#allocation6], 1 }
  0xcc   :  { %464 = vsyncpa [#allocation4], 1 }

</bundles_post_ra>
